<compile_context>
chip_gen: v7x
topology: tpu7x:2x2x1
jax: 0.10.0
libtpu: 0.0.40
codegen_flags: <defaults>
</compile_context>

<pallas_src>
import functools

import jax
import jax.numpy as jnp
from jax.experimental import pallas as pl
from jax.experimental.pallas import tpu as pltpu


def _nca_tile_kernel(temp_ref, t_col_ref, t_row_ref, sq_col_ref, sq_row_ref,
                     pred_ref, pred_t_ref, out_ref, num_acc, den_acc, *,
                     n_valid):
    j = pl.program_id(0)                      # column tile (parallel)
    i = pl.program_id(1)                      # row tile (reduction, innermost)

    @pl.when(i == 0)
    def _():
        num_acc[...] = jnp.zeros_like(num_acc)
        den_acc[...] = jnp.zeros_like(den_acc)

    x = pred_ref[...]                         # (TM, d), native dtype
    xt = pred_t_ref[...]                      # (d, TN), native dtype
    tm = x.shape[0]
    tn = xt.shape[1]

    # Gram slab on the MXU, f32 accumulation.
    gram = jnp.dot(x, xt, preferred_element_type=jnp.float32)         # (TM, TN)

    # Squared pairwise distances for this (row, column) tile.
    p_norm = sq_col_ref[...] + sq_row_ref[...] - 2.0 * gram
    p_norm = jnp.maximum(p_norm, 1e-10)

    temp = temp_ref[0, 0]
    dist = jnp.exp(p_norm * (-1.0 / temp))                             # EUP

    # Global indices for this tile (one full-size iota + one (1,TN) row only).
    row_ids = jax.lax.broadcasted_iota(jnp.int32, (tm, tn), 0) + i * tm
    col_row = jax.lax.broadcasted_iota(jnp.int32, (1, tn), 1) + j * tn

    valid_row = row_ids < n_valid                                      # mask padded rows
    not_self = row_ids != col_row
    same = t_col_ref[...] == t_row_ref[...]                            # (TM,1) vs (1,TN)

    pos_mask = same & not_self & valid_row
    neg_mask = (~same) & valid_row            # self is always same-class -> no eye needed

    num_acc[...] += jnp.sum(jnp.where(pos_mask, dist, 0.0), axis=0, keepdims=True)
    den_acc[...] += jnp.sum(jnp.where(neg_mask, dist, 0.0), axis=0, keepdims=True)

    @pl.when(i == pl.num_programs(1) - 1)
    def _():
        num = num_acc[...]
        den = jnp.maximum(den_acc[...], 1e-10)
        frac = num / (num + den)
        take = (frac >= 1e-10) & (col_row < n_valid)                   # padded cols -> 0
        out_ref[...] = jnp.where(take, jnp.log(jnp.where(take, frac, 1.0)), 0.0)


def _tpu_vmem_capacity_bytes():
    try:
        return int(pltpu.get_tpu_info().vmem_capacity_bytes)
    except Exception:
        return 64 * 1024 * 1024               # conservative (v7x per-TensorCore)


def few_shot_nca_loss(pred, target, temperature, *, tile_n=512, tile_m=256):
    """pred: (n, d) float32/bfloat16; target: (n,) int; temperature: scalar."""
    n, d = pred.shape
    itemsize = jnp.dtype(pred.dtype).itemsize

    vmem_cap = _tpu_vmem_capacity_bytes()
    budget = max(vmem_cap // 3, 24 * 1024 * 1024)

    # Lane/sublane aligned tile sizes, shrunk until the per-step footprint fits.
    n_col_aligned = pl.cdiv(n, 128) * 128
    n_row_aligned = pl.cdiv(n, 8) * 8
    tn = min(tile_n, n_col_aligned)
    tm = min(tile_m, n_row_aligned)

    def step_bytes(tm_, tn_):
        return (2 * tm_ * d * itemsize        # pred row blocks (double-buffered)
                + 2 * d * tn_ * itemsize      # pred^T column slabs
                + 6 * tm_ * tn_ * 4           # gram / p_norm / dist / mask temporaries
                + 16 * tn_ * 4)               # row vectors, accumulators, output

    while tn > 128 and step_bytes(tm, tn) > budget:
        tn = max(128, (tn // 2) // 128 * 128)
    while tm > 8 and step_bytes(tm, tn) > budget:
        tm = max(8, (tm // 2) // 8 * 8)

    # Keep >= 2 column tiles when possible so the "parallel" axis can feed both
    # TensorCores on dual-TC chips (v7x); harmless on single-TC v5e/v6e.
    if n_col_aligned >= 256 and pl.cdiv(n_col_aligned, tn) < 2:
        tn = max(128, (n_col_aligned // 2) // 128 * 128)

    n_pad = pl.cdiv(n, tn) * tn
    n_row_pad = pl.cdiv(n, tm) * tm
    num_col_tiles = n_pad // tn
    num_row_tiles = n_row_pad // tm
    pad_c = n_pad - n
    pad_r = n_row_pad - n

    temp = jnp.full((1, 1), temperature, dtype=jnp.float32)

    tgt = target.astype(jnp.int32)
    t_col = jnp.pad(tgt.reshape(n, 1), ((0, pad_r), (0, 0)), constant_values=-1)
    t_row = jnp.pad(tgt.reshape(1, n), ((0, 0), (0, pad_c)), constant_values=-1)

    sq = jnp.sum(pred.astype(jnp.float32) ** 2, axis=1)                # f32 norms
    sq_col = jnp.pad(sq.reshape(n, 1), ((0, pad_r), (0, 0)))
    sq_row = jnp.pad(sq.reshape(1, n), ((0, 0), (0, pad_c)))

    pred_rows = jnp.pad(pred, ((0, pad_r), (0, 0)))                    # (n_row_pad, d)
    pred_t = jnp.pad(pred.T, ((0, 0), (0, pad_c)))                     # (d, n_pad)

    kernel = functools.partial(_nca_tile_kernel, n_valid=n)

    cost = pl.CostEstimate(
        flops=2 * n_row_pad * d * n_pad,
        transcendentals=n_row_pad * n_pad,
        bytes_accessed=(num_col_tiles * pred_rows.size + pred_t.size) * itemsize
        + 4 * (t_col.size + t_row.size + sq_col.size + sq_row.size + n_pad),
    )

    vmem_limit = int(min(max(4 * step_bytes(tm, tn), 32 * 1024 * 1024),
                         vmem_cap, 100 * 1024 * 1024))

    log_terms = pl.pallas_call(
        kernel,
        out_shape=jax.ShapeDtypeStruct((1, n_pad), jnp.float32),
        grid=(num_col_tiles, num_row_tiles),
        in_specs=[
            pl.BlockSpec(memory_space=pltpu.MemorySpace.SMEM),         # temperature (1,1)
            pl.BlockSpec((tm, 1), lambda j, i: (i, 0)),                # target row block
            pl.BlockSpec((1, tn), lambda j, i: (0, j)),                # target col slab
            pl.BlockSpec((tm, 1), lambda j, i: (i, 0)),                # ||x||^2 row block
            pl.BlockSpec((1, tn), lambda j, i: (0, j)),                # ||x||^2 col slab
            pl.BlockSpec((tm, d), lambda j, i: (i, 0)),                # pred row block
            pl.BlockSpec((d, tn), lambda j, i: (0, j)),                # pred^T col slab
        ],
        out_specs=pl.BlockSpec((1, tn), lambda j, i: (0, j)),          # lane-dense output
        scratch_shapes=[pltpu.VMEM((1, tn), jnp.float32),              # numerators
                        pltpu.VMEM((1, tn), jnp.float32)],             # denominators
        compiler_params=pltpu.CompilerParams(
            dimension_semantics=("parallel", "arbitrary"),
            vmem_limit_bytes=vmem_limit),
        cost_estimate=cost,
    )(temp, t_col, t_row, sq_col, sq_row, pred_rows, pred_t)

    return -jnp.sum(log_terms) / jnp.float32(n)


def _reference_nca_loss(pred, target, temperature):
    """Pure-JAX reference mirroring the PyTorch forward (frac_* == 1)."""
    n, _ = pred.shape
    pred = pred.astype(jnp.float32)
    sq = jnp.sum(pred * pred, axis=1)
    p_norm = sq[:, None] + sq[None, :] - 2.0 * pred @ pred.T
    p_norm = jnp.maximum(p_norm, 1e-10)
    dist = jnp.exp(-p_norm / temperature)
    same = (target[:, None] == target[None, :]).astype(jnp.float32)
    eye = jnp.eye(n, dtype=jnp.float32)
    positives = same - eye
    negatives = 1.0 - same
    numerators = jnp.sum(dist * positives, axis=0)
    denominators = jnp.maximum(jnp.sum(dist * negatives, axis=0), 1e-10)
    frac = numerators / (numerators + denominators)
    valid = frac >= 1e-10
    log_terms = jnp.where(valid, jnp.log(jnp.where(valid, frac, 1.0)), 0.0)
    return -jnp.sum(log_terms) / n


if __name__ == "__main__":
    # --- small config (module-scale example) ---
    n, d, classes = 8, 32, 4
    temperature = 32.0  # the module's learnable scalar; chosen so dist is non-degenerate
    k_pred, k_tgt = jax.random.split(jax.random.PRNGKey(0))
    pred = jax.random.normal(k_pred, (n, d), dtype=jnp.float32)
    target = jax.random.randint(k_tgt, (n,), 0, classes, dtype=jnp.int32)

    loss = jax.block_until_ready(few_shot_nca_loss(pred, target, temperature))
    ref = _reference_nca_loss(pred, target, temperature)
    assert jnp.allclose(loss, ref, rtol=1e-4, atol=1e-5), (loss, ref)

    # --- multi-tile config (exercises row accumulation + padded row/col masks) ---
    n2, d2, classes2 = 300, 64, 10
    temperature2 = 100.0
    k_pred2, k_tgt2 = jax.random.split(jax.random.PRNGKey(1))
    pred2 = jax.random.normal(k_pred2, (n2, d2), dtype=jnp.float32)
    target2 = jax.random.randint(k_tgt2, (n2,), 0, classes2, dtype=jnp.int32)

    loss2 = jax.block_until_ready(few_shot_nca_loss(pred2, target2, temperature2))
    ref2 = _reference_nca_loss(pred2, target2, temperature2)
    assert jnp.allclose(loss2, ref2, rtol=1e-4, atol=1e-5), (loss2, ref2)

    print("KERNEL_OK")
</pallas_src>

<mosaic_0001>
module attributes {stable_mosaic.version = 11 : i64} {
  func.func @_nca_tile_kernel(%arg0: i32, %arg1: i32, %arg2: memref<1x1xf32, #tpu.memory_space<smem>>, %arg3: memref<8x1xi32, #tpu.memory_space<vmem>>, %arg4: memref<1x128xi32, #tpu.memory_space<vmem>>, %arg5: memref<8x1xf32, #tpu.memory_space<vmem>>, %arg6: memref<1x128xf32, #tpu.memory_space<vmem>>, %arg7: memref<8x32xf32, #tpu.memory_space<vmem>>, %arg8: memref<32x128xf32, #tpu.memory_space<vmem>>, %arg9: memref<1x128xf32, #tpu.memory_space<vmem>>, %arg10: memref<1x128xf32, #tpu.memory_space<vmem>>, %arg11: memref<1x128xf32, #tpu.memory_space<vmem>>) attributes {dimension_semantics = [#tpu.dimension_semantics<parallel>, #tpu.dimension_semantics<arbitrary>], iteration_bounds = array<i64: 1, 1>, scalar_prefetch = 0 : i64, scratch_operands = 2 : i64, tpu.core_type = #tpu.core_type<tc>, window_params = [{transform_indices = @transform_0, window_bounds = array<i64: 1, 1>}, {transform_indices = @transform_1, window_bounds = array<i64: 8, 1>}, {transform_indices = @transform_2, window_bounds = array<i64: 1, 128>}, {transform_indices = @transform_3, window_bounds = array<i64: 8, 1>}, {transform_indices = @transform_4, window_bounds = array<i64: 1, 128>}, {transform_indices = @transform_5, window_bounds = array<i64: 8, 32>}, {transform_indices = @transform_6, window_bounds = array<i64: 32, 128>}, {transform_indices = @transform_7, window_bounds = array<i64: 1, 128>}]} {
    %c0_i32 = arith.constant 0 : i32
    %0 = arith.cmpi eq, %arg1, %c0_i32 : i32
    %1 = arith.extui %0 : i1 to i32
    %c0_i32_0 = arith.constant 0 : i32
    %2 = arith.cmpi ne, %1, %c0_i32_0 : i32
    scf.if %2 {
      %cst_33 = arith.constant 0.000000e+00 : f32
      %59 = vector.broadcast %cst_33 : f32 to vector<1x128xf32>
      %c0_34 = arith.constant 0 : index
      %c0_35 = arith.constant 0 : index
      %60 = vector.load %arg10[%c0_34, %c0_35] : memref<1x128xf32, #tpu.memory_space<vmem>>, vector<1x128xf32>
      tpu.vector_store %arg10[%c0_34, %c0_35], %59 {strides = array<i32>} : memref<1x128xf32, #tpu.memory_space<vmem>>, vector<1x128xf32>,
      %cst_36 = arith.constant 0.000000e+00 : f32
      %61 = vector.broadcast %cst_36 : f32 to vector<1x128xf32>
      %c0_37 = arith.constant 0 : index
      %c0_38 = arith.constant 0 : index
      %62 = vector.load %arg11[%c0_37, %c0_38] : memref<1x128xf32, #tpu.memory_space<vmem>>, vector<1x128xf32>
      tpu.vector_store %arg11[%c0_37, %c0_38], %61 {strides = array<i32>} : memref<1x128xf32, #tpu.memory_space<vmem>>, vector<1x128xf32>,
    } else {
    }
    %c0 = arith.constant 0 : index
    %c0_1 = arith.constant 0 : index
    %3 = vector.load %arg7[%c0, %c0_1] : memref<8x32xf32, #tpu.memory_space<vmem>>, vector<8x32xf32>
    %c0_2 = arith.constant 0 : index
    %c0_3 = arith.constant 0 : index
    %4 = vector.load %arg8[%c0_2, %c0_3] : memref<32x128xf32, #tpu.memory_space<vmem>>, vector<32x128xf32>
    %cst = arith.constant dense<0.000000e+00> : vector<8x128xf32>
    %5 = tpu.matmul %3, %4, %cst {dimension_numbers = #tpu.dot_dimension_numbers<[1], [0], [0], [1], [0, 0, 1, 1], [], []>} : vector<8x32xf32>, vector<32x128xf32>, vector<8x128xf32> -> vector<8x128xf32>
    %c0_4 = arith.constant 0 : index
    %c0_5 = arith.constant 0 : index
    %6 = vector.load %arg5[%c0_4, %c0_5] : memref<8x1xf32, #tpu.memory_space<vmem>>, vector<8x1xf32>
    %c0_6 = arith.constant 0 : index
    %c0_7 = arith.constant 0 : index
    %7 = vector.load %arg6[%c0_6, %c0_7] : memref<1x128xf32, #tpu.memory_space<vmem>>, vector<1x128xf32>
    %8 = vector.broadcast %6 : vector<8x1xf32> to vector<8x128xf32>
    %9 = vector.broadcast %7 : vector<1x128xf32> to vector<8x128xf32>
    %10 = arith.addf %8, %9 : vector<8x128xf32>
    %cst_8 = arith.constant 2.000000e+00 : f32
    %11 = vector.broadcast %cst_8 : f32 to vector<8x128xf32>
    %12 = arith.mulf %11, %5 : vector<8x128xf32>
    %13 = arith.subf %10, %12 : vector<8x128xf32>
    %cst_9 = arith.constant 1.000000e-10 : f32
    %14 = vector.broadcast %cst_9 : f32 to vector<8x128xf32>
    %15 = arith.maximumf %13, %14 : vector<8x128xf32>
    %c0_10 = arith.constant 0 : index
    %c0_11 = arith.constant 0 : index
    %16 = memref.load %arg2[%c0_10, %c0_11] : memref<1x1xf32, #tpu.memory_space<smem>>
    %cst_12 = arith.constant -1.000000e+00 : f32
    %17 = arith.divf %cst_12, %16 : f32
    %18 = vector.broadcast %17 : f32 to vector<8x128xf32>
    %19 = arith.mulf %15, %18 : vector<8x128xf32>
    %20 = math.exp %19 : vector<8x128xf32>
    %21 = tpu.iota {dimensions = array<i32: 0>} : vector<8x128xi32>
    %c8_i32 = arith.constant 8 : i32
    %22 = arith.muli %arg1, %c8_i32 : i32
    %23 = vector.broadcast %22 : i32 to vector<8x128xi32>
    %24 = arith.addi %21, %23 : vector<8x128xi32>
    %25 = tpu.iota {dimensions = array<i32: 1>} : vector<1x128xi32>
    %c128_i32 = arith.constant 128 : i32
    %26 = arith.muli %arg0, %c128_i32 : i32
    %27 = vector.broadcast %26 : i32 to vector<1x128xi32>
    %28 = arith.addi %25, %27 : vector<1x128xi32>
    %c8_i32_13 = arith.constant 8 : i32
    %29 = vector.broadcast %c8_i32_13 : i32 to vector<8x128xi32>
    %30 = arith.cmpi slt, %24, %29 : vector<8x128xi32>
    %31 = vector.broadcast %28 : vector<1x128xi32> to vector<8x128xi32>
    %32 = arith.cmpi ne, %24, %31 : vector<8x128xi32>
    %c0_14 = arith.constant 0 : index
    %c0_15 = arith.constant 0 : index
    %33 = vector.load %arg3[%c0_14, %c0_15] : memref<8x1xi32, #tpu.memory_space<vmem>>, vector<8x1xi32>
    %c0_16 = arith.constant 0 : index
    %c0_17 = arith.constant 0 : index
    %34 = vector.load %arg4[%c0_16, %c0_17] : memref<1x128xi32, #tpu.memory_space<vmem>>, vector<1x128xi32>
    %35 = vector.broadcast %33 : vector<8x1xi32> to vector<8x128xi32>
    %36 = vector.broadcast %34 : vector<1x128xi32> to vector<8x128xi32>
    %37 = arith.cmpi eq, %35, %36 : vector<8x128xi32>
    %38 = arith.andi %37, %32 : vector<8x128xi1>
    %39 = arith.andi %38, %30 : vector<8x128xi1>
    %cst_18 = arith.constant dense<true> : vector<8x128xi1>
    %40 = arith.xori %37, %cst_18 : vector<8x128xi1>
    %41 = arith.andi %40, %30 : vector<8x128xi1>
    %c0_19 = arith.constant 0 : index
    %c0_20 = arith.constant 0 : index
    %42 = vector.load %arg10[%c0_19, %c0_20] : memref<1x128xf32, #tpu.memory_space<vmem>>, vector<1x128xf32>
    %cst_21 = arith.constant 0.000000e+00 : f32
    %43 = vector.broadcast %cst_21 : f32 to vector<8x128xf32>
    %44 = arith.select %39, %20, %43 : vector<8x128xi1>, vector<8x128xf32>
    %cst_22 = arith.constant dense<0.000000e+00> : vector<128xf32>
    %45 = vector.multi_reduction <add>, %44, %cst_22 [0] : vector<8x128xf32> to vector<128xf32>
    %46 = vector.shape_cast %45 : vector<128xf32> to vector<1x128xf32>
    %47 = arith.addf %42, %46 : vector<1x128xf32>
    %c0_23 = arith.constant 0 : index
    %c0_24 = arith.constant 0 : index
    %48 = vector.load %arg10[%c0_23, %c0_24] : memref<1x128xf32, #tpu.memory_space<vmem>>, vector<1x128xf32>
    tpu.vector_store %arg10[%c0_23, %c0_24], %47 {strides = array<i32>} : memref<1x128xf32, #tpu.memory_space<vmem>>, vector<1x128xf32>,
    %c0_25 = arith.constant 0 : index
    %c0_26 = arith.constant 0 : index
    %49 = vector.load %arg11[%c0_25, %c0_26] : memref<1x128xf32, #tpu.memory_space<vmem>>, vector<1x128xf32>
    %cst_27 = arith.constant 0.000000e+00 : f32
    %50 = vector.broadcast %cst_27 : f32 to vector<8x128xf32>
    %51 = arith.select %41, %20, %50 : vector<8x128xi1>, vector<8x128xf32>
    %cst_28 = arith.constant dense<0.000000e+00> : vector<128xf32>
    %52 = vector.multi_reduction <add>, %51, %cst_28 [0] : vector<8x128xf32> to vector<128xf32>
    %53 = vector.shape_cast %52 : vector<128xf32> to vector<1x128xf32>
    %54 = arith.addf %49, %53 : vector<1x128xf32>
    %c0_29 = arith.constant 0 : index
    %c0_30 = arith.constant 0 : index
    %55 = vector.load %arg11[%c0_29, %c0_30] : memref<1x128xf32, #tpu.memory_space<vmem>>, vector<1x128xf32>
    tpu.vector_store %arg11[%c0_29, %c0_30], %54 {strides = array<i32>} : memref<1x128xf32, #tpu.memory_space<vmem>>, vector<1x128xf32>,
    %c0_i32_31 = arith.constant 0 : i32
    %56 = arith.cmpi eq, %arg1, %c0_i32_31 : i32
    %57 = arith.extui %56 : i1 to i32
    %c0_i32_32 = arith.constant 0 : i32
    %58 = arith.cmpi ne, %57, %c0_i32_32 : i32
    scf.if %58 {
      %c0_33 = arith.constant 0 : index
      %c0_34 = arith.constant 0 : index
      %59 = vector.load %arg10[%c0_33, %c0_34] : memref<1x128xf32, #tpu.memory_space<vmem>>, vector<1x128xf32>
      %c0_35 = arith.constant 0 : index
      %c0_36 = arith.constant 0 : index
      %60 = vector.load %arg11[%c0_35, %c0_36] : memref<1x128xf32, #tpu.memory_space<vmem>>, vector<1x128xf32>
      %cst_37 = arith.constant 1.000000e-10 : f32
      %61 = vector.broadcast %cst_37 : f32 to vector<1x128xf32>
      %62 = arith.maximumf %60, %61 : vector<1x128xf32>
      %63 = arith.addf %59, %62 : vector<1x128xf32>
      %64 = arith.divf %59, %63 : vector<1x128xf32>
      %cst_38 = arith.constant 1.000000e-10 : f32
      %65 = vector.broadcast %cst_38 : f32 to vector<1x128xf32>
      %66 = arith.cmpf oge, %64, %65 : vector<1x128xf32>
      %c8_i32_39 = arith.constant 8 : i32
      %67 = vector.broadcast %c8_i32_39 : i32 to vector<1x128xi32>
      %68 = arith.cmpi slt, %28, %67 : vector<1x128xi32>
      %69 = arith.andi %66, %68 : vector<1x128xi1>
      %cst_40 = arith.constant 1.000000e+00 : f32
      %70 = vector.broadcast %cst_40 : f32 to vector<1x128xf32>
      %71 = arith.select %69, %64, %70 : vector<1x128xi1>, vector<1x128xf32>
      %72 = math.log %71 : vector<1x128xf32>
      %cst_41 = arith.constant 0.000000e+00 : f32
      %73 = vector.broadcast %cst_41 : f32 to vector<1x128xf32>
      %74 = arith.select %69, %72, %73 : vector<1x128xi1>, vector<1x128xf32>
      %c0_42 = arith.constant 0 : index
      %c0_43 = arith.constant 0 : index
      %75 = vector.load %arg9[%c0_42, %c0_43] : memref<1x128xf32, #tpu.memory_space<vmem>>, vector<1x128xf32>
      tpu.vector_store %arg9[%c0_42, %c0_43], %74 {strides = array<i32>} : memref<1x128xf32, #tpu.memory_space<vmem>>, vector<1x128xf32>,
    } else {
    }
    return
  }
  func.func @transform_0(%arg0: i32, %arg1: i32) -> (i32, i32) {
    %c0_i32 = arith.constant 0 : i32
    %c0_i32_0 = arith.constant 0 : i32
    %c0_i32_1 = arith.constant 0 : i32
    return %c0_i32, %c0_i32_0 : i32, i32
  }
  func.func @transform_1(%arg0: i32, %arg1: i32) -> (i32, i32) {
    %c0_i32 = arith.constant 0 : i32
    %c0_i32_0 = arith.constant 0 : i32
    return %arg1, %c0_i32 : i32, i32
  }
  func.func @transform_2(%arg0: i32, %arg1: i32) -> (i32, i32) {
    %c0_i32 = arith.constant 0 : i32
    %c0_i32_0 = arith.constant 0 : i32
    return %c0_i32, %arg0 : i32, i32
  }
  func.func @transform_3(%arg0: i32, %arg1: i32) -> (i32, i32) {
    %c0_i32 = arith.constant 0 : i32
    %c0_i32_0 = arith.constant 0 : i32
    return %arg1, %c0_i32 : i32, i32
  }
  func.func @transform_4(%arg0: i32, %arg1: i32) -> (i32, i32) {
    %c0_i32 = arith.constant 0 : i32
    %c0_i32_0 = arith.constant 0 : i32
    return %c0_i32, %arg0 : i32, i32
  }
  func.func @transform_5(%arg0: i32, %arg1: i32) -> (i32, i32) {
    %c0_i32 = arith.constant 0 : i32
    %c0_i32_0 = arith.constant 0 : i32
    return %arg1, %c0_i32 : i32, i32
  }
  func.func @transform_6(%arg0: i32, %arg1: i32) -> (i32, i32) {
    %c0_i32 = arith.constant 0 : i32
    %c0_i32_0 = arith.constant 0 : i32
    return %c0_i32, %arg0 : i32, i32
  }
  func.func @transform_7(%arg0: i32, %arg1: i32) -> (i32, i32) {
    %c0_i32 = arith.constant 0 : i32
    %c0_i32_0 = arith.constant 0 : i32
    return %c0_i32, %arg0 : i32, i32
  }
}

</mosaic_0001>

<bundles_post_ra>
// kernel: tpu_custom_call.1
= control target key start
LH: loop header
LB: loop body
LE: loop exit
PB: predicated region body
PF: predicated region fallthrough
CT: control target
= control target key end

     0   :  { %13 = vsyncpa [#allocation6], 0  ;;  %s466_s0 = inlined_call_operand.<no memory space> [shape: f32[1,1], index: 0, kind: input, shape index: {}]   ;;  %s467_s1 = inlined_call_operand.vmem [shape: s32[8,1], index: 1, kind: input, shape index: {}]   ;;  %s468_s2 = inlined_call_operand.hbm [shape: s32[1,128], index: 2, kind: input, shape index: {}]   ;;  %s469_s3 = inlined_call_operand.vmem [shape: f32[8,1], index: 3, kind: input, shape index: {}]   ;;  %s470_s4 = inlined_call_operand.hbm [shape: f32[1,128], index: 4, kind: input, shape index: {}]   ;;  %s471_s5 = inlined_call_operand.vmem [shape: f32[8,32], index: 5, kind: input, shape index: {}]   ;;  %s472_s6 = inlined_call_operand.vmem [shape: f32[32,128], index: 6, kind: input, shape index: {}]   ;;  %s473_s7 = inlined_call_operand.hbm [shape: f32[1,128], index: 7, kind: output, shape index: {}]  }
   0x1   :  { %14 = vsyncpa [#allocation9], 0 }
   0x2   :  { %15 = vsyncpa [#allocation7], 0  ;;  %s358_s24 = smov [#allocation5]   ;;  %s359_s26 = smov [#allocation8]  }
   0x3   :  { %s26_s25 = sshll.u32 %s358_s24, 4  ;;  %s38_s27 = sshll.u32 %s359_s26, 4  ;;  %s27_s25 = int_to_ptr.vmem [resolvable:$true] %s26_s25  ;;  %s39_s27 = int_to_ptr.vmem [resolvable:$true] %s38_s27 }
   0x4   :  { %s286_s30 = scalar_lea.hbm %s468_s2, 16 }
   0x5   :  { %p287_p0 = scmp.ne.s32.totalorder %s468_s2, %s286_s30  ;;  %p290_p1 = scmp.lt.u32.totalorder %s286_s30, %s468_s2 }
   0x7   :  { %p292_p2 = pnand %p290_p1, %p287_p0 }
   0x9   :  { %295 = shalt.err (!%p292_p2)
}
   0xa   :  { %s296_s12 = scalar_lea.vmem %s27_s25, 16  ;;  %s300_s13 = scalar_lea.vmem %s27_s25, 32 }
   0xb   :  { %p297_p3 = scmp.ne.s32.totalorder %s27_s25, %s296_s12  ;;  %p301_p4 = scmp.lt.s32.totalorder %s27_s25, %s27_s25 }
   0xc   :  { %p302_p5 = scmp.lt.s32.totalorder %s300_s13, %s296_s12 }
   0xe   :  { %p303_p6 = por %p302_p5, %p301_p4 }
  0x10   :  { %p304_p7 = pnand %p303_p6, %p297_p3 }
  0x12   :  { %307 = shalt.err (!%p304_p7)
}
  0x13   :  { %29 = dma.hbm_to_vmem [thread:$0]  %s468_s2, 16, %s27_s25, [#allocation6]  }
  0x14   :  { %s308_s18 = scalar_lea.hbm %s470_s4, 16 }
  0x15   :  { %p309_p8 = scmp.ne.s32.totalorder %s470_s4, %s308_s18  ;;  %p312_p9 = scmp.lt.u32.totalorder %s308_s18, %s470_s4 }
  0x17   :  { %p314_p10 = pnand %p312_p9, %p309_p8 }
  0x19   :  { %317 = shalt.err (!%p314_p10)
}
  0x1a   :  { %s318_s23 = scalar_lea.vmem %s39_s27, 16  ;;  %s322_s24 = scalar_lea.vmem %s39_s27, 32 }
  0x1b   :  { %p319_p11 = scmp.ne.s32.totalorder %s39_s27, %s318_s23  ;;  %p323_p12 = scmp.lt.s32.totalorder %s39_s27, %s39_s27 }
  0x1c   :  { %p324_p13 = scmp.lt.s32.totalorder %s322_s24, %s318_s23 }
  0x1e   :  { %p325_p0 = por %p324_p13, %p323_p12 }
  0x20   :  { %p326_p1 = pnand %p325_p0, %p319_p11 }
  0x22   :  { %329 = shalt.err (!%p326_p1)
}
  0x23   :  { %41 = dma.hbm_to_vmem [thread:$0]  %s470_s4, 16, %s39_s27, [#allocation9]  }
  0x24   :  { %352 = dma.done.wait [#allocation6], 16  }
  0x25   :  { %353 = vsyncadd [#allocation6], 4294967280 }
  0x26   :  { %354 = dma.done.wait [#allocation9], 16  }
  0x27   :  { %355 = vsyncadd [#allocation9], 4294967280  ;;  %v360_v0 = vmov 0.0|0.0   ;;  %v361_v1 = vmov 0.0   ;;  %vm362_vm0 = vmmov 0   ;;  %v155_v2 = vstv %s466_s0  ;;  %v59_v4 = vld [vmem:[%s472_s6] sm:$0xff] }
  0x28   :  { %261 = vmatprep.subr.bf16.mxu0 %v360_v0  ;;  %56 = vst [vmem:[#allocation2] sm:$0x1] %v361_v1  ;;  %57 = vst [vmem:[#allocation3] sm:$0x1] %v361_v1  ;;  %258 = vmatprep.mubr.msk.f32.mxu0 %vm362_vm0, %v361_v1  ;;  %v363_v3 = vmov 0   ;;  %278 = vrcp.f32 %v155_v2  ;;  %v60_v5 = vld [vmem:[%s472_s6 + $0x8] sm:$0xff]  ;;  %v163_v24 = vlaneseq }
  0x29   :  { %277 = vset.pattern.permute.xlu0 %v363_v3  ;;  %v61_v6 = vld [vmem:[%s472_s6 + $0x10] sm:$0xff]  ;;  %v262_v7 = vpack.c.bf16 %v60_v5, %v59_v4  ;;  %v62_v8 = vld [vmem:[%s472_s6 + $0x18] sm:$0xff]  ;;  %v137_v9 = vld [vmem:[%s469_s3] sm:$0xff]  ;;  %vm63_vm1 = vcmask 261120   ;;  %vm364_vm5 = vmmov 1  }
  0x2a   :  { %141 = vperm.xlu0 %277, %v137_v9   ;;  %v265_v10 = vpack.c.bf16 %v62_v8, %v61_v6  ;;  %v175_v11 = vld [vmem:[%s467_s1] sm:$0xff]  ;;  %v164_v26 = vshrl.u32 %v163_v24, 7  ;;  %v169_v27 = vand.u32 127, %v163_v24  ;;  %s365_s1 = smov [#allocation10]  }
  0x2b   :  { %263 = vmatpush3.bf16.msra.mxu0 %v262_v7  ;;  %v58_v13 = vld [vmem:[%s471_s5] sm:$0xff]  ;;  %s232_s5 = sshll.u32 %s365_s1, 4  ;;  %s233_s5 = int_to_ptr.vmem [resolvable:$true] %s232_s5 }
  0x2c   :  { %264 = vmatprep.subr.bf16.mxu0 %v360_v0  ;;  %v243_v14 = vld [vmem:[#allocation8] ss:$0 sm:$0xff]  ;;  %v244_v28 = vld [vmem:[#allocation5] ss:$0 sm:$0xff]  ;;  %vm174_vm2 = vcmp.ne.s32.totalorder %v164_v26, %v169_v27  ;;  %vm219_vm7 = vcmp.lt.s32.totalorder %v169_v27, 8  ;;  %s330_s17 = scalar_lea.vmem %s233_s5, 16  ;;  %p335_p3 = scmp.lt.s32.totalorder %s233_s5, %s233_s5 }
  0x2d   :  { %p331_p2 = scmp.ne.s32.totalorder %s233_s5, %s330_s17  ;;  %s334_s18 = scalar_lea.vmem %s233_s5, 32 }
  0x2e   :  { %178 = vperm.xlu0 %277, %v175_v11   ;;  %p336_p4 = scmp.lt.s32.totalorder %s334_s18, %s330_s17 }
  0x2f   :  { %266 = vmatpush3.bf16.msra.mxu0 %v265_v10  ;;  %v189_v43 = vld [vmem:[#allocation2] sm:$0x1]  ;;  %v199_v44 = vld [vmem:[#allocation3] sm:$0x1] }
  0x30   :  { %p337_p5 = por %p336_p4, %p335_p3 }
  0x32   :  { %v279_v12 = vpop.eup %278  ;;  %259 = vmatmul.mubr.msk.f32.vlgmr.msra.gmra.mrb[0].mxu0 %vm63_vm1, %v58_v13  ;;  %p338_p6 = pnand %p337_p5, %p331_p2 }
  0x33   :  { %267 = vpush %v279_v12 }
  0x64   :  { %s268_s3 = spop %267 }
  0x65   :  { %s158_s6 = smul.f32 -1.0, %s268_s3 }
  0x67   :  { %v159_v21 = vstv %s158_s6 }
  0xa9   :  { %v142_v15 = vpop.permute.xlu0 %141 }
  0xaa   :  { %v150_v16 = vadd.f32 %v243_v14, %v142_v15 }
  0xad   :  { %v179_v29 = vpop.permute.xlu0 %178 }
  0xae   :  { %vm184_vm3 = vcmp.eq.s32.totalorder %v179_v29, %v244_v28 }
  0xaf   :  { %vm185_vm4 = vmand %vm184_vm3, %vm174_vm2 }
  0xb0   :  { %vm187_vm6 = vmxor %vm184_vm3, %vm364_vm5 }
 0x105   :  { %v133_v17 = vpop.f32.mrb[0].mxu0 }
 0x106   :  { %v151_v18 = vmul.f32 2.0, %v133_v17  ;;  %v260_v19 = vpop.f32.mrb[1].mxu0 }
 0x108   :  { %v152_v20 = vsub.f32 %v150_v16, %v151_v18 }
 0x10a   :  { %v153_v22 = vmax.f32 %v152_v20, 1e-10 }
 0x10c   :  { %v160_v23 = vmul.f32 %v159_v21, %v153_v22 }
 0x10e   :  { %v161_v25 = vmul.f32 1.442695, %v160_v23 }
 0x110   :  { %280 = vpow2.f32 %v161_v25 }
 0x11a   :  { %v281_v30 = vpop.eup %280 }
 0x11b   :  { %v190_v31 = vsel %vm185_vm4, %v281_v30, 0.0  ;;  %v200_v32 = vsel %vm187_vm6, %v281_v30, 0.0 }
 0x11c   :  { %v191_v33 = vrot.slane %v190_v31, 4  ;;  %v201_v34 = vrot.slane %v200_v32, 4 }
 0x11e   :  { %v192_v35 = vadd.f32 %v191_v33, %v190_v31  ;;  %v202_v36 = vadd.f32 %v201_v34, %v200_v32 }
 0x120   :  { %v193_v37 = vrot.slane %v192_v35, 2  ;;  %v203_v38 = vrot.slane %v202_v36, 2 }
 0x122   :  { %v194_v39 = vadd.f32 %v193_v37, %v192_v35  ;;  %v204_v40 = vadd.f32 %v203_v38, %v202_v36 }
 0x124   :  { %v195_v41 = vrot.slane %v194_v39, 1  ;;  %v205_v42 = vrot.slane %v204_v40, 1 }
 0x126   :  { %v196_v45 = vadd.f32 %v195_v41, %v194_v39  ;;  %v206_v46 = vadd.f32 %v205_v42, %v204_v40 }
 0x128   :  { %v197_v47 = vadd.f32 %v196_v45, %v189_v43  ;;  %v207_v48 = vadd.f32 %v206_v46, %v199_v44 }
 0x12a   :  { %198 = vst [vmem:[#allocation2] sm:$0x1] %v197_v47  ;;  %208 = vst [vmem:[#allocation3] sm:$0x1] %v207_v48 }
 0x131   :  { %v213_v49 = vld [vmem:[#allocation3] sm:$0x1]  ;;  %v212_v51 = vld [vmem:[#allocation2] sm:$0x1] }
 0x132   :  { %v214_v50 = vmax.f32 %v213_v49, 1e-10 }
 0x134   :  { %v215_v52 = vadd.f32 %v214_v50, %v212_v51 }
 0x136   :  { %282 = vrcp.f32 %v215_v52 }
 0x140   :  { %v283_v53 = vpop.eup %282 }
 0x141   :  { %v217_v54 = vmul.f32 %v283_v53, %v212_v51 }
 0x143   :  { %vm218_vm8 = vcmp.ge.f32.partialorder %v217_v54, 1e-10 }
 0x144   :  { %vm220_vm9 = vmand %vm218_vm8, %vm219_vm7 }
 0x145   :  { %v221_v55 = vsel %vm220_vm9, %v217_v54, 1.0 }
 0x146   :  { %284 = vlog2.f32 %v221_v55 }
 0x150   :  { %v285_v56 = vpop.eup %284 }
 0x151   :  { %v223_v57 = vmul.f32 0.6931472, %v285_v56 }
 0x153   :  { %v224_v58 = vsel %vm220_vm9, %v223_v57, 0.0 }
 0x154   :  { %225 = vst [vmem:[#allocation10] sm:$0x1] %v224_v58 }
 0x155   :  { %341 = shalt.err (!%p338_p6)
}
 0x156   :  { %s342_s21 = scalar_lea.hbm %s473_s7, 16 }
 0x157   :  { %p343_p7 = scmp.ne.s32.totalorder %s473_s7, %s342_s21  ;;  %p346_p8 = scmp.lt.u32.totalorder %s342_s21, %s473_s7 }
 0x159   :  { %p348_p9 = pnand %p346_p8, %p343_p7 }
 0x15b   :  { %351 = shalt.err (!%p348_p9)
}
 0x15c   :  { %235 = dma.vmem_to_hbm [thread:$0]  %s233_s5, 16, %s473_s7, [#allocation7]  }
 0x15d   :  { %356 = dma.done.wait [#allocation7], 16  }
 0x15e   :  { %357 = vsyncadd [#allocation7], 4294967280 }
 0x15f   :  { %239 = vsyncpa [#allocation6], 1 }
 0x160   :  { %240 = vsyncpa [#allocation9], 1 }
 0x161   :  { %241 = vsyncpa [#allocation7], 1 }

</bundles_post_ra>
